<compile_context>
chip_gen: v5e
topology: v5e:2x2
jax: 0.10.0
libtpu: 0.0.40
codegen_flags: <defaults>
</compile_context>

<pallas_src>
import jax
import jax.numpy as jnp
from jax.experimental import pallas as pl
from jax.experimental.pallas import tpu as pltpu

_F32 = jnp.float32
_VMEM_BUDGET = 44 * (1 << 20)      # conservative vs v7x 64 MiB physical VMEM per TC
_VMEM_LIMIT_CAP = 56 * (1 << 20)


def _round_up(x, m):
    return ((x + m - 1) // m) * m


# ---------------------------------------------------------------------------
# Kernels
# ---------------------------------------------------------------------------
def _collapsed_t_kernel(qT_ref, aT_ref, mt_ref, u_ref, v_ref, c_ref, out_ref):
    """Collapsed form, transposed layout (D < 128).

    qT/aT: (D, bb) act_dtype; mt: (D, D) act_dtype = M^T; u/v: (D, 1) f32;
    c: (1, 1) f32; out: (1, bb) f32 (lane-dense).
    """
    qT = qT_ref[...]
    aT = aT_ref[...]
    # (q @ M)^T = M^T @ q^T : one MXU matmul, batch sits on the lane axis.
    qmT = jnp.dot(mt_ref[...], qT, preferred_element_type=jnp.float32)
    q32 = qT.astype(jnp.float32)
    a32 = aT.astype(jnp.float32)
    combined = qmT * a32 + q32 * u_ref[...] + a32 * v_ref[...]
    out_ref[...] = jnp.sum(combined, axis=0, keepdims=True) + c_ref[...]


def _collapsed_n_kernel(q_ref, a_ref, m_ref, u_ref, v_ref, c_ref, out_ref):
    """Collapsed form, natural layout (D >= 128): no transposes anywhere.

    q/a: (bb, D) act_dtype; m: (D, D) act_dtype; u/v: (1, D) f32; c: (1, 1) f32;
    out: (bb, 1) f32.  Lane-axis (XLU) reduction over D.
    """
    q = q_ref[...]
    a = a_ref[...]
    qm = jnp.dot(q, m_ref[...], preferred_element_type=jnp.float32)
    q32 = q.astype(jnp.float32)
    a32 = a.astype(jnp.float32)
    combined = qm * a32 + q32 * u_ref[...] + a32 * v_ref[...]
    out_ref[...] = jnp.sum(combined, axis=1, keepdims=True) + c_ref[...]


def _factored_kernel(q_ref, a_ref, w1t_ref, w2t_ref, b1_ref, b2_ref, out_ref):
    """Factored rank-P form (D > 2.4*P): two skinny MXU matmuls.

    q/a: (bb, D) act_dtype; w1t/w2t: (D, P) act_dtype; b1/b2: (1, P) f32;
    out: (bb, 1) f32.
    """
    op = jnp.dot(q_ref[...], w1t_ref[...], preferred_element_type=jnp.float32) + b1_ref[...]
    ap = jnp.dot(a_ref[...], w2t_ref[...], preferred_element_type=jnp.float32) + b2_ref[...]
    out_ref[...] = jnp.sum(op * ap, axis=1, keepdims=True)


# ---------------------------------------------------------------------------
# Tiling / VMEM budget
# ---------------------------------------------------------------------------
def _pick_block_b(B, D, act_bytes, resident_bytes, mult):
    """Batch tile: ~1 MiB of streamed q+a bytes per grid step, >= 2 grid steps
    for B >= 256 (v7x dual TensorCore), bounded by the VMEM budget."""

    def vmem_est(bb):
        return (2 * resident_bytes                 # weights/biases, double-buffered
                + 2 * 2 * bb * D * act_bytes       # q, a tiles, double-buffered
                + 3 * bb * D * 4                   # f32 matmul + epilogue temporaries
                + 2 * bb * 4)                      # output tile

    if vmem_est(mult) > _VMEM_BUDGET:
        # TODO(synk): weights don't fit VMEM-resident (very large D); add an
        # "arbitrary" grid axis over row-chunks of M / W1 with a (bb, 1) f32
        # accumulator (pl.when init/finalize) instead of failing.
        raise NotImplementedError(
            "QuadraticForm weights too large for a VMEM-resident Pallas kernel.")

    desired = max(mult, (1 << 20) // max(1, 2 * D * act_bytes))
    if B >= 256:                                   # keep >= 2 grid steps (megacore)
        desired = min(desired, (B + 1) // 2)
    while desired > mult and vmem_est(desired) > _VMEM_BUDGET:
        desired //= 2

    if desired >= B:
        block_b = B                                # full dim is always a legal block
    else:
        block_b = max(mult, (desired // mult) * mult)

    vmem_limit = int(min(_VMEM_LIMIT_CAP, max(32 << 20, vmem_est(block_b) * 5 // 4)))
    return block_b, vmem_limit


# ---------------------------------------------------------------------------
# Wrapper: fold weights once, return jitted apply
# ---------------------------------------------------------------------------
def make_quadratic_form(wq, bq, wa, ba, wop, bop, *, act_dtype=jnp.bfloat16,
                        block_b=None, collapse_ratio=2.4):
    """Fold the three Linears once (hoisted out of the hot path) and return a
    jitted apply(question, answer) -> (B,).

    Note: the algebraic folds below are only valid for the Identity-activation
    projection branch of the original module.
    """
    hp = jax.lax.Precision.HIGHEST
    wq32, wa32, wop32 = (jnp.asarray(w, _F32) for w in (wq, wa, wop))
    bq32, ba32, bop32 = (jnp.asarray(b, _F32) for b in (bq, ba, bop))
    P, D = wq32.shape
    assert wa32.shape == (P, D) and wop32.shape == (P, P)
    assert bq32.shape == (P,) and ba32.shape == (P,) and bop32.shape == (P,)

    act_bytes = jnp.dtype(act_dtype).itemsize
    c0 = jnp.dot(wop32, bq32, precision=hp) + bop32            # (P,) = Wop bq + bop

    use_collapsed = D <= collapse_ratio * P
    if use_collapsed:
        # out = q M a^T + q.u + a.v + c
        m = jnp.dot(jnp.dot(wq32.T, wop32.T, precision=hp), wa32, precision=hp)
        u = jnp.dot(wq32.T, jnp.dot(wop32.T, ba32, precision=hp), precision=hp)
        v = jnp.dot(wa32.T, c0, precision=hp)
        c = jnp.dot(c0, ba32, precision=hp).reshape(1, 1)
        resident = D * D * act_bytes + (2 * D + 1) * 4

        if D < 128:
            # Transposed layout: features on sublanes, batch on lanes.
            mt = m.T.astype(act_dtype)
            u_col, v_col = u.reshape(D, 1), v.reshape(D, 1)

            @jax.jit
            def apply(question, answer):
                B, d_in = question.shape
                assert d_in == D and answer.shape == (B, D)
                bb, vmem_limit = ((block_b, _VMEM_LIMIT_CAP) if block_b
                                  else _pick_block_b(B, D, act_bytes, resident, 128))
                # bf16 cast BEFORE the transpose: half-size transposed HBM copy.
                qT = question.astype(act_dtype).T
                aT = answer.astype(act_dtype).T
                out = pl.pallas_call(
                    _collapsed_t_kernel,
                    out_shape=jax.ShapeDtypeStruct((1, B), _F32),
                    grid_spec=pltpu.PrefetchScalarGridSpec(
                        num_scalar_prefetch=0,
                        grid=(pl.cdiv(B, bb),),
                        in_specs=[
                            pl.BlockSpec((D, bb), lambda i: (0, i)),
                            pl.BlockSpec((D, bb), lambda i: (0, i)),
                            pl.BlockSpec((D, D), lambda i: (0, 0)),
                            pl.BlockSpec((D, 1), lambda i: (0, 0)),
                            pl.BlockSpec((D, 1), lambda i: (0, 0)),
                            pl.BlockSpec((1, 1), lambda i: (0, 0)),
                        ],
                        out_specs=pl.BlockSpec((1, bb), lambda i: (0, i)),
                    ),
                    compiler_params=pltpu.CompilerParams(
                        dimension_semantics=("parallel",),
                        vmem_limit_bytes=vmem_limit),
                )(qT, aT, mt, u_col, v_col, c)
                return out[0]

            return apply

        # Natural layout (D >= 128): no wrapper-side transposes at all.
        m_act = m.astype(act_dtype)
        u_row, v_row = u.reshape(1, D), v.reshape(1, D)

        @jax.jit
        def apply(question, answer):
            B, d_in = question.shape
            assert d_in == D and answer.shape == (B, D)
            bb, vmem_limit = ((block_b, _VMEM_LIMIT_CAP) if block_b
                              else _pick_block_b(B, D, act_bytes, resident, 8))
            q = question.astype(act_dtype)
            a = answer.astype(act_dtype)
            out = pl.pallas_call(
                _collapsed_n_kernel,
                out_shape=jax.ShapeDtypeStruct((B, 1), _F32),
                grid_spec=pltpu.PrefetchScalarGridSpec(
                    num_scalar_prefetch=0,
                    grid=(pl.cdiv(B, bb),),
                    in_specs=[
                        pl.BlockSpec((bb, D), lambda i: (i, 0)),
                        pl.BlockSpec((bb, D), lambda i: (i, 0)),
                        pl.BlockSpec((D, D), lambda i: (0, 0)),
                        pl.BlockSpec((1, D), lambda i: (0, 0)),
                        pl.BlockSpec((1, D), lambda i: (0, 0)),
                        pl.BlockSpec((1, 1), lambda i: (0, 0)),
                    ],
                    out_specs=pl.BlockSpec((bb, 1), lambda i: (i, 0)),
                ),
                compiler_params=pltpu.CompilerParams(
                    dimension_semantics=("parallel",),
                    vmem_limit_bytes=vmem_limit),
            )(q, a, m_act, u_row, v_row, c)
            return out[:, 0]

        return apply

    # Factored rank-P form (P << D): W1 = Wop Wq (P, D), b1 = Wop bq + bop.
    w1t = jnp.dot(wop32, wq32, precision=hp).T.astype(act_dtype)   # (D, P)
    w2t = wa32.T.astype(act_dtype)                                  # (D, P)
    b1_row = c0.reshape(1, P)
    b2_row = ba32.reshape(1, P)
    resident = 2 * D * P * act_bytes + 2 * P * 4

    @jax.jit
    def apply(question, answer):
        B, d_in = question.shape
        assert d_in == D and answer.shape == (B, D)
        bb, vmem_limit = ((block_b, _VMEM_LIMIT_CAP) if block_b
                          else _pick_block_b(B, D, act_bytes, resident, 8))
        q = question.astype(act_dtype)
        a = answer.astype(act_dtype)
        out = pl.pallas_call(
            _factored_kernel,
            out_shape=jax.ShapeDtypeStruct((B, 1), _F32),
            grid_spec=pltpu.PrefetchScalarGridSpec(
                num_scalar_prefetch=0,
                grid=(pl.cdiv(B, bb),),
                in_specs=[
                    pl.BlockSpec((bb, D), lambda i: (i, 0)),
                    pl.BlockSpec((bb, D), lambda i: (i, 0)),
                    pl.BlockSpec((D, P), lambda i: (0, 0)),
                    pl.BlockSpec((D, P), lambda i: (0, 0)),
                    pl.BlockSpec((1, P), lambda i: (0, 0)),
                    pl.BlockSpec((1, P), lambda i: (0, 0)),
                ],
                out_specs=pl.BlockSpec((bb, 1), lambda i: (i, 0)),
            ),
            compiler_params=pltpu.CompilerParams(
                dimension_semantics=("parallel",),
                vmem_limit_bytes=vmem_limit),
        )(q, a, w1t, w2t, b1_row, b2_row)
        return out[:, 0]

    return apply


def quadratic_form(question, answer, wq, bq, wa, ba, wop, bop, *,
                   act_dtype=jnp.bfloat16):
    """One-shot convenience wrapper (re-folds weights every call; prefer
    make_quadratic_form when the weights are static)."""
    return make_quadratic_form(wq, bq, wa, ba, wop, bop,
                               act_dtype=act_dtype)(question, answer)


def reference(question, answer, wq, bq, wa, ba, wop, bop):
    qp = question @ wq.T + bq
    ap = answer @ wa.T + ba
    op = qp @ wop.T + bop
    return jnp.sum(op * ap, axis=-1)


if __name__ == "__main__":
    key = jax.random.PRNGKey(0)

    def make_inputs(k, B, D, P):
        ks = jax.random.split(k, 8)
        question = jax.random.normal(ks[0], (B, D), dtype=jnp.float32)
        answer = jax.random.normal(ks[1], (B, D), dtype=jnp.float32)
        # nn.Linear parameter shapes: (out_features, in_features), (out_features,)
        wq = jax.random.normal(ks[2], (P, D), dtype=jnp.float32) * 0.1
        bq = jax.random.normal(ks[3], (P,), dtype=jnp.float32) * 0.1
        wa = jax.random.normal(ks[4], (P, D), dtype=jnp.float32) * 0.1
        ba = jax.random.normal(ks[5], (P,), dtype=jnp.float32) * 0.1
        wop = jax.random.normal(ks[6], (P, P), dtype=jnp.float32) * 0.1
        bop = jax.random.normal(ks[7], (P,), dtype=jnp.float32) * 0.1
        return question, answer, (wq, bq, wa, ba, wop, bop)

    # (B, D, P, act_dtype, tol): exercises all three kernel paths.
    configs = [
        (8, 32, 32, jnp.float32, 1e-3),     # collapsed, transposed layout, f32
        (8, 32, 32, jnp.bfloat16, 5e-2),    # collapsed, transposed, bf16 streaming
        (16, 128, 64, jnp.bfloat16, 5e-2),  # collapsed, natural layout (D >= 128)
        (16, 128, 32, jnp.bfloat16, 5e-2),  # factored rank-P (D > 2.4*P)
    ]
    keys = jax.random.split(key, len(configs))
    for k, (B, D, P, act_dtype, tol) in zip(keys, configs):
        question, answer, params = make_inputs(k, B, D, P)
        apply_fn = make_quadratic_form(*params, act_dtype=act_dtype)
        out = jax.block_until_ready(apply_fn(question, answer))
        ref = reference(question, answer, *params)
        assert out.shape == (B,), (out.shape, B)
        err = float(jnp.max(jnp.abs(out - ref)) / (jnp.max(jnp.abs(ref)) + 1e-6))
        assert err < tol, (B, D, P, str(act_dtype), err)

    print("KERNEL_OK")
</pallas_src>

<mosaic_0001>
module attributes {stable_mosaic.version = 11 : i64} {
  func.func @_collapsed_t_kernel(%arg0: i32, %arg1: memref<32x8xf32, #tpu.memory_space<vmem>>, %arg2: memref<32x8xf32, #tpu.memory_space<vmem>>, %arg3: memref<32x32xf32, #tpu.memory_space<vmem>>, %arg4: memref<32x1xf32, #tpu.memory_space<vmem>>, %arg5: memref<32x1xf32, #tpu.memory_space<vmem>>, %arg6: memref<1x1xf32, #tpu.memory_space<vmem>>, %arg7: memref<1x8xf32, #tpu.memory_space<vmem>>) attributes {dimension_semantics = [#tpu.dimension_semantics<parallel>], iteration_bounds = array<i64: 1>, scalar_prefetch = 0 : i64, scratch_operands = 0 : i64, tpu.core_type = #tpu.core_type<tc>, window_params = [{transform_indices = @transform_0, window_bounds = array<i64: 32, 8>}, {transform_indices = @transform_1, window_bounds = array<i64: 32, 8>}, {pipeline_mode = #tpu.pipeline_mode<synchronous>, transform_indices = @transform_2, window_bounds = array<i64: 32, 32>}, {pipeline_mode = #tpu.pipeline_mode<synchronous>, transform_indices = @transform_3, window_bounds = array<i64: 32, 1>}, {pipeline_mode = #tpu.pipeline_mode<synchronous>, transform_indices = @transform_4, window_bounds = array<i64: 32, 1>}, {pipeline_mode = #tpu.pipeline_mode<synchronous>, transform_indices = @transform_5, window_bounds = array<i64: 1, 1>}, {transform_indices = @transform_6, window_bounds = array<i64: 1, 8>}]} {
    %c0 = arith.constant 0 : index
    %c0_0 = arith.constant 0 : index
    %0 = vector.load %arg1[%c0, %c0_0] : memref<32x8xf32, #tpu.memory_space<vmem>>, vector<32x8xf32>
    %c0_1 = arith.constant 0 : index
    %c0_2 = arith.constant 0 : index
    %1 = vector.load %arg2[%c0_1, %c0_2] : memref<32x8xf32, #tpu.memory_space<vmem>>, vector<32x8xf32>
    %c0_3 = arith.constant 0 : index
    %c0_4 = arith.constant 0 : index
    %2 = vector.load %arg3[%c0_3, %c0_4] : memref<32x32xf32, #tpu.memory_space<vmem>>, vector<32x32xf32>
    %cst = arith.constant dense<0.000000e+00> : vector<32x8xf32>
    %3 = tpu.matmul %2, %0, %cst {dimension_numbers = #tpu.dot_dimension_numbers<[1], [0], [0], [1], [0, 0, 1, 1], [], []>} : vector<32x32xf32>, vector<32x8xf32>, vector<32x8xf32> -> vector<32x8xf32>
    %4 = arith.mulf %3, %1 : vector<32x8xf32>
    %c0_5 = arith.constant 0 : index
    %c0_6 = arith.constant 0 : index
    %5 = vector.load %arg4[%c0_5, %c0_6] : memref<32x1xf32, #tpu.memory_space<vmem>>, vector<32x1xf32>
    %6 = vector.broadcast %5 : vector<32x1xf32> to vector<32x8xf32>
    %7 = arith.mulf %0, %6 : vector<32x8xf32>
    %8 = arith.addf %4, %7 : vector<32x8xf32>
    %c0_7 = arith.constant 0 : index
    %c0_8 = arith.constant 0 : index
    %9 = vector.load %arg5[%c0_7, %c0_8] : memref<32x1xf32, #tpu.memory_space<vmem>>, vector<32x1xf32>
    %10 = vector.broadcast %9 : vector<32x1xf32> to vector<32x8xf32>
    %11 = arith.mulf %1, %10 : vector<32x8xf32>
    %12 = arith.addf %8, %11 : vector<32x8xf32>
    %cst_9 = arith.constant dense<0.000000e+00> : vector<8xf32>
    %13 = vector.multi_reduction <add>, %12, %cst_9 [0] : vector<32x8xf32> to vector<8xf32>
    %14 = vector.shape_cast %13 : vector<8xf32> to vector<1x8xf32>
    %c0_10 = arith.constant 0 : index
    %c0_11 = arith.constant 0 : index
    %15 = vector.load %arg6[%c0_10, %c0_11] : memref<1x1xf32, #tpu.memory_space<vmem>>, vector<1x1xf32>
    %16 = vector.broadcast %15 : vector<1x1xf32> to vector<1x8xf32>
    %17 = arith.addf %14, %16 : vector<1x8xf32>
    %c0_12 = arith.constant 0 : index
    %c0_13 = arith.constant 0 : index
    %18 = vector.load %arg7[%c0_12, %c0_13] : memref<1x8xf32, #tpu.memory_space<vmem>>, vector<1x8xf32>
    tpu.vector_store %arg7[%c0_12, %c0_13], %17 {strides = array<i32>} : memref<1x8xf32, #tpu.memory_space<vmem>>, vector<1x8xf32>,
    return
  }
  func.func @transform_0(%arg0: i32) -> (i32, i32) {
    %c0_i32 = arith.constant 0 : i32
    %c0_i32_0 = arith.constant 0 : i32
    return %c0_i32, %arg0 : i32, i32
  }
  func.func @transform_1(%arg0: i32) -> (i32, i32) {
    %c0_i32 = arith.constant 0 : i32
    %c0_i32_0 = arith.constant 0 : i32
    return %c0_i32, %arg0 : i32, i32
  }
  func.func @transform_2(%arg0: i32) -> (i32, i32) {
    %c0_i32 = arith.constant 0 : i32
    %c0_i32_0 = arith.constant 0 : i32
    %c0_i32_1 = arith.constant 0 : i32
    return %c0_i32, %c0_i32_0 : i32, i32
  }
  func.func @transform_3(%arg0: i32) -> (i32, i32) {
    %c0_i32 = arith.constant 0 : i32
    %c0_i32_0 = arith.constant 0 : i32
    %c0_i32_1 = arith.constant 0 : i32
    return %c0_i32, %c0_i32_0 : i32, i32
  }
  func.func @transform_4(%arg0: i32) -> (i32, i32) {
    %c0_i32 = arith.constant 0 : i32
    %c0_i32_0 = arith.constant 0 : i32
    %c0_i32_1 = arith.constant 0 : i32
    return %c0_i32, %c0_i32_0 : i32, i32
  }
  func.func @transform_5(%arg0: i32) -> (i32, i32) {
    %c0_i32 = arith.constant 0 : i32
    %c0_i32_0 = arith.constant 0 : i32
    %c0_i32_1 = arith.constant 0 : i32
    return %c0_i32, %c0_i32_0 : i32, i32
  }
  func.func @transform_6(%arg0: i32) -> (i32, i32) {
    %c0_i32 = arith.constant 0 : i32
    %c0_i32_0 = arith.constant 0 : i32
    return %c0_i32, %arg0 : i32, i32
  }
}

</mosaic_0001>

<bundles_post_ra>
// kernel: apply.1
= control target key start
LH: loop header
LB: loop body
LE: loop exit
PB: predicated region body
PF: predicated region fallthrough
CT: control target
= control target key end

     0   :  { %s396_s0 = inlined_call_operand.vmem [shape: f32[32,8], index: 0, kind: input, shape index: {}]   ;;  %s397_s1 = inlined_call_operand.vmem [shape: f32[32,8], index: 1, kind: input, shape index: {}]   ;;  %s398_s2 = inlined_call_operand.hbm [shape: f32[32,32], index: 2, kind: input, shape index: {}]   ;;  %s399_s3 = inlined_call_operand.vmem [shape: f32[32,1], index: 3, kind: input, shape index: {}]   ;;  %s400_s4 = inlined_call_operand.vmem [shape: f32[32,1], index: 4, kind: input, shape index: {}]   ;;  %s401_s5 = inlined_call_operand.<no memory space> [shape: f32[1,1], index: 5, kind: input, shape index: {}]   ;;  %s402_s6 = inlined_call_operand.hbm [shape: f32[1,8], index: 6, kind: output, shape index: {}]  }
   0x1   :  { %v11_v0 = vstv %s401_s5 }
   0x2   :  { %12 = vst [vmem:[#allocation2] sm:$0x1] %v11_v0 }
   0x3   :  { %13 = vsyncpa [#allocation4], 0 }
   0x4   :  { %14 = vsyncpa [#allocation5], 0  ;;  %s23_s25 = sshll.u32 %s398_s2, 4  ;;  %s281_s26 = smov [#allocation3]   ;;  %s24_s25 = int_to_ptr.hbm [resolvable:$true] %s23_s25 }
   0x5   :  { %s25_s27 = sshll.u32 %s281_s26, 4  ;;  %s282_s28 = smov 128   ;;  %s26_s27 = int_to_ptr.vmem [resolvable:$true] %s25_s27 }
   0x6   :  { %s283_s29 = smov 8  }
   0x7   :  { %31 = dma.hbm_to_vmem [thread:$0]  %s24_s25, 512, %s26_s27, [#allocation4], %s282_s28, %s282_s28, %s283_s29  }
   0x8   :  { %277 = dma.done.wait [#allocation4], 512  }
   0x9   :  { %278 = vsyncadd [#allocation4], 4294966784  ;;  %v284_v1 = vmov 0   ;;  %v102_v2 = vld [vmem:[%s399_s3 + $0x10] sm:$0xff]  ;;  %v100_v3 = vld [vmem:[%s399_s3] sm:$0xff]  ;;  %vm54_vm0 = vcmask 261120  }
   0xa   :  { %227 = vset.pattern.permute.xlu1 %v284_v1  ;;  %226 = vset.pattern.permute.xlu0 %v284_v1  ;;  %v336_v4 = vld [vmem:[%s396_s0 + $0x18] sm:$0xff]  ;;  %v341_v5 = vld [vmem:[%s396_s0 + $0x10] sm:$0xff]  ;;  %v43_v6 = vld [vmem:[%s396_s0 + $0x8] sm:$0xff]  ;;  %vm164_vm1 = vcmask 64512   ;;  %s195_s10 = sshll.u32 %s402_s6, 4  ;;  %vm186_vm2 = vcmask 57344   ;;  %s196_s10 = int_to_ptr.hbm [resolvable:$true] %s195_s10 }
   0xb   :  { %228 = vset.pattern.permute.xlu2 %v284_v1  ;;  %116 = vperm.xlu1 %227, %v102_v2   ;;  %v42_v7 = vld [vmem:[%s396_s0] sm:$0xff]  ;;  %v51_v9 = vld [vmem:[#allocation3 + $0x8] sm:$0xff]  ;;  %v52_v10 = vld [vmem:[#allocation3 + $0x10] sm:$0xff] }
   0xc   :  { %106 = vperm.xlu0 %226, %v100_v3   ;;  %79 = vmatpush.msra.mxu0 %v336_v4  ;;  %v50_v8 = vld [vmem:[#allocation3] sm:$0xff]  ;;  %v53_v11 = vld [vmem:[#allocation3 + $0x18] sm:$0xff]  ;;  %v134_v16 = vld [vmem:[%s400_s4 + $0x10] sm:$0xff] }
   0xd   :  { %209 = vmatpush.msra.mxu1 %v336_v4  ;;  %210 = vmatpush.msra.mxu2 %v336_v4  ;;  %v132_v12 = vld [vmem:[%s400_s4] sm:$0xff]  ;;  %v101_v13 = vld [vmem:[%s399_s3 + $0x8] sm:$0xff]  ;;  %v135_v15 = vld [vmem:[%s400_s4 + $0x18] sm:$0xff] }
   0xe   :  { %211 = vmatpush.msra.mxu3 %v336_v4  ;;  %80 = vmatpush.msra.mxu0 %v341_v5  ;;  %v133_v14 = vld [vmem:[%s400_s4 + $0x8] sm:$0xff]  ;;  %v103_v17 = vld [vmem:[%s399_s3 + $0x18] sm:$0xff]  ;;  %v178_v18 = vld [vmem:[#allocation2] sm:$0x1] }
   0xf   :  { %212 = vmatpush.msra.mxu1 %v341_v5  ;;  %213 = vmatpush.msra.mxu2 %v341_v5  ;;  %v47_v24 = vld [vmem:[%s397_s1 + $0x8] sm:$0xff]  ;;  %v46_v25 = vld [vmem:[%s397_s1] sm:$0xff]  ;;  %v49_v38 = vld [vmem:[%s397_s1 + $0x18] sm:$0xff] }
  0x10   :  { %214 = vmatpush.msra.mxu3 %v341_v5  ;;  %81 = vmatpush.msra.mxu0 %v43_v6  ;;  %v48_v40 = vld [vmem:[%s397_s1 + $0x10] sm:$0xff]  ;;  %s285_s1 = smov [#allocation6]  }
  0x11   :  { %215 = vmatpush.msra.mxu1 %v43_v6  ;;  %216 = vmatpush.msra.mxu2 %v43_v6  ;;  %s193_s8 = sshll.u32 %s285_s1, 4  ;;  %s194_s8 = int_to_ptr.vmem [resolvable:$true] %s193_s8 }
  0x12   :  { %217 = vmatpush.msra.mxu3 %v43_v6  ;;  %82 = vmatpush.msra.mxu0 %v42_v7 }
  0x13   :  { %218 = vmatpush.msra.mxu1 %v42_v7  ;;  %219 = vmatpush.msra.mxu2 %v42_v7 }
  0x14   :  { %220 = vmatpush.msra.mxu3 %v42_v7  ;;  %205 = vmatmul.msk.f32.vlgmr.msra.gmra.mxu0 %vm54_vm0, %v50_v8 }
  0x15   :  { %206 = vmatmul.msk.f32.vlgmr.msra.gmra.mxu1 %vm54_vm0, %v51_v9  ;;  %207 = vmatmul.msk.f32.vlgmr.msra.gmra.mxu2 %vm54_vm0, %v52_v10 }
  0x16   :  { %208 = vmatmul.msk.f32.vlgmr.msra.gmra.mxu3 %vm54_vm0, %v53_v11  ;;  %138 = vperm.xlu1 %227, %v132_v12  }
  0x17   :  { %111 = vperm.xlu0 %226, %v101_v13   ;;  %143 = vperm.xlu2 %228, %v133_v14  }
  0x1e   :  { %153 = vperm.xlu1 %227, %v135_v15  }
  0x1f   :  { %148 = vperm.xlu0 %226, %v134_v16   ;;  %121 = vperm.xlu2 %228, %v103_v17  }
  0x27   :  { %181 = vperm.xlu2 %228, %v178_v18  }
  0x71   :  { %v144_v21 = vpop.permute.xlu2 %143 }
  0x72   :  { %v157_v34 = vmul.f32 %v144_v21, %v47_v24 }
  0x79   :  { %v122_v36 = vpop.permute.xlu2 %121 }
  0x7a   :  { %v127_v46 = vmul.f32 %v122_v36, %v336_v4 }
  0x7d   :  { %v117_v19 = vpop.permute.xlu1 %116 }
  0x7e   :  { %v107_v20 = vpop.permute.xlu0 %106  ;;  %v126_v45 = vmul.f32 %v117_v19, %v341_v5 }
  0x7f   :  { %v124_v28 = vmul.f32 %v107_v20, %v42_v7 }
  0x81   :  { %v182_v2 = vpop.permute.xlu2 %181 }
  0x82   :  { %v184_v4 = vperm.slane %v182_v2, 0 }
  0x88   :  { %v139_v22 = vpop.permute.xlu1 %138 }
  0x89   :  { %v112_v23 = vpop.permute.xlu0 %111  ;;  %v156_v35 = vmul.f32 %v139_v22, %v46_v25 }
  0x8a   :  { %v125_v29 = vmul.f32 %v112_v23, %v43_v6 }
  0x90   :  { %v154_v37 = vpop.permute.xlu1 %153 }
  0x91   :  { %v84_v26 = vpop.f32.mrf.mxu0  ;;  %v149_v39 = vpop.permute.xlu0 %148  ;;  %v159_v49 = vmul.f32 %v154_v37, %v49_v38 }
  0x92   :  { %v87_v27 = vpop.f32.mrf.mxu1  ;;  %v96_v30 = vmul.f32 %v84_v26, %v46_v25  ;;  %v158_v50 = vmul.f32 %v149_v39, %v48_v40 }
  0x93   :  { %v97_v31 = vmul.f32 %v87_v27, %v47_v24 }
  0x94   :  { %v128_v32 = vadd.f32 %v124_v28, %v96_v30 }
  0x95   :  { %v129_v33 = vadd.f32 %v125_v29, %v97_v31 }
  0x96   :  { %v160_v41 = vadd.f32 %v156_v35, %v128_v32 }
  0x97   :  { %v161_v42 = vadd.f32 %v157_v34, %v129_v33 }
  0x98   :  { %v90_v43 = vpop.f32.mrf.mxu2  ;;  %v165_v51 = vsel %vm164_vm1, %v160_v41, 0.0 }
  0x99   :  { %v93_v44 = vpop.f32.mrf.mxu3  ;;  %v98_v47 = vmul.f32 %v90_v43, %v48_v40  ;;  %v166_v52 = vsel %vm164_vm1, %v161_v42, 0.0 }
  0x9a   :  { %v99_v48 = vmul.f32 %v93_v44, %v49_v38  ;;  %v167_v57 = vadd.f32 %v166_v52, %v165_v51 }
  0x9b   :  { %v130_v53 = vadd.f32 %v126_v45, %v98_v47 }
  0x9c   :  { %v131_v54 = vadd.f32 %v127_v46, %v99_v48 }
  0x9d   :  { %v162_v55 = vadd.f32 %v158_v50, %v130_v53 }
  0x9e   :  { %v163_v56 = vadd.f32 %v159_v49, %v131_v54 }
  0x9f   :  { %v168_v58 = vsel %vm164_vm1, %v162_v55, 0.0 }
  0xa0   :  { %v169_v59 = vadd.f32 %v168_v58, %v167_v57  ;;  %v170_v60 = vsel %vm164_vm1, %v163_v56, 0.0 }
  0xa2   :  { %v171_v61 = vadd.f32 %v170_v60, %v169_v59 }
  0xa4   :  { %v172_v62 = vrot.slane %v171_v61, 4 }
  0xa6   :  { %v173_v63 = vadd.f32 %v172_v62, %v171_v61 }
  0xa8   :  { %v174_v0 = vrot.slane %v173_v63, 2 }
  0xaa   :  { %v175_v1 = vadd.f32 %v174_v0, %v173_v63 }
  0xac   :  { %v176_v3 = vrot.slane %v175_v1, 1 }
  0xae   :  { %v177_v5 = vadd.f32 %v176_v3, %v175_v1 }
  0xb0   :  { %v185_v6 = vadd.f32 %v184_v4, %v177_v5 }
  0xb2   :  { %187 = vst.msk [vmem:[#allocation6] sm:$0x1] %vm186_vm2, %v185_v6 }
  0xb3   :  { %198 = dma.vmem_to_hbm [thread:$0]  %s194_s8, 16, %s196_s10, [#allocation5]  }
  0xb4   :  { %279 = dma.done.wait [#allocation5], 16  }
  0xb5   :  { %280 = vsyncadd [#allocation5], 4294967280 }
  0xb6   :  { %203 = vsyncpa [#allocation4], 1 }
  0xb7   :  { %204 = vsyncpa [#allocation5], 1 }

</bundles_post_ra>
